<compile_context>
chip_gen: v5e
topology: v5e:2x2
jax: 0.10.0
libtpu: 0.0.40
codegen_flags: <defaults>
</compile_context>

<pallas_src>
import math

import numpy as np

import jax
import jax.numpy as jnp
from jax.experimental import pallas as pl
from jax.experimental.pallas import tpu as pltpu


LAMBDA_ALLDIFF = 200.0
LAMBDA_INEQ = 1.0
BIN_WEIGHT = 0.1


def _round_up(x, m):
    return ((x + m - 1) // m) * m


def _make_kernel(D, N, tile_r, total_rows):
    """NR-loss kernel for static (num_days D, num_nurses N, rows tile)."""

    def kernel(x_ref, s_ref, pair_ref, day_ref, ineq_ref):
        # x_ref   : (tile_r, 9N)   one (batch, day) row per sublane row
        # s_ref   : (3, 9N, N)     constant slot-selection matrices (resident)
        # pair_ref: (tile_r, 1)    1.0 unless the row is the last day of a batch
        # day_ref, ineq_ref: (1, 8, 128) lane-dense per-tile partial sums
        i = pl.program_id(0)
        x = x_ref[...].astype(jnp.float32)                        # (tile_r, 9N)

        # ---- slot sums on the MXU (no lane-unaligned slices) ----
        first3 = jnp.dot(x, s_ref[0], preferred_element_type=jnp.float32)
        mid3 = jnp.dot(x, s_ref[1], preferred_element_type=jnp.float32)
        last3 = jnp.dot(x, s_ref[2], preferred_element_type=jnp.float32)

        # ---- ragged-tail mask (no jnp.pad): select kills OOB garbage/NaN ----
        rows = jax.lax.broadcasted_iota(jnp.int32, (tile_r, 1), 0)
        limit = total_rows - i * tile_r                            # valid rows here
        valid = rows < limit                                       # (tile_r, 1)

        day_sum = jnp.where(valid, first3 + mid3 + last3, 0.0)     # (tile_r, N)
        pen = jnp.maximum(day_sum - 1.0, 0.0)
        day_partial = jnp.sum(pen * pen
                              + BIN_WEIGHT * (day_sum - day_sum * day_sum))

        if D > 1:
            # last shift of day d * first shift of day d+1: one sublane shift.
            prod = last3[:tile_r - 1, :] * first3[1:, :]           # (tile_r-1, N)
            overlap = jnp.sum(prod, axis=-1, keepdims=True)        # (tile_r-1, 1)
            # static day-boundary mask (blocks start on batch boundaries) ...
            overlap = overlap * pair_ref[:tile_r - 1, :]
            # ... and runtime validity of the (d+1) row; select kills NaN.
            overlap = jnp.where(rows[:tile_r - 1, :] + 1 < limit, overlap, 0.0)
            ineq_partial = jnp.sum(overlap * overlap)
        else:
            ineq_partial = jnp.float32(0.0)

        # Lane-dense per-tile partials (summed in the wrapper) -> grid axis can
        # be "parallel" (both TensorCores on v7x).
        day_ref[...] = jnp.full(day_ref.shape, day_partial, jnp.float32)
        ineq_ref[...] = jnp.full(ineq_ref.shape, ineq_partial, jnp.float32)

    return kernel


def custom_nr_loss_mse(predictions, *, block_vmem_bytes=20 * 1024 * 1024,
                       _force_rows=None):
    """predictions: (B, num_days*3*3, num_nurses) float -> scalar f32 loss."""
    B, slots, N = predictions.shape
    assert slots % 9 == 0, "second dim must be num_days * 3 * 3"
    D = slots // 9
    R = B * D

    # Free contiguous reshape: rows = (batch, day), lanes = slot-major 9*N.
    x = predictions.reshape(R, 9 * N)
    itemsize = jnp.dtype(x.dtype).itemsize

    # Constant 0/1 selection matrices: group g sums slots 3g..3g+2
    # (g=0 first shift, g=1 mid shift, g=2 last shift; each sums nurses_per_shift).
    sel = np.zeros((3, 9 * N, N), np.float32)
    eye = np.eye(N, dtype=np.float32)
    for g in range(3):
        for k in range(3):
            slot = 3 * g + k
            sel[g, slot * N:(slot + 1) * N, :] = eye
    sel = jnp.asarray(sel)

    # Row tile: multiple of lcm(D, sublane) so every block starts on a batch
    # boundary (the day pairing never crosses a block) and sublanes stay aligned.
    sublane = {4: 8, 2: 16, 1: 32}.get(itemsize, 8)
    unit = D * sublane // math.gcd(D, sublane)
    lanes_x = _round_up(9 * N, 128)
    lanes_g = _round_up(N, 128)
    # double-buffered input + f32 in-kernel temporaries + pair-mask buffers
    per_row_bytes = 2 * lanes_x * itemsize + 8 * lanes_g * 4 + 2 * 128 * 4
    budget_rows = max(unit, (block_vmem_bytes // per_row_bytes) // unit * unit)
    if _force_rows is not None:                 # test hook: force small tiles
        budget_rows = max(unit, (_force_rows // unit) * unit)
    tile_r = R if R <= budget_rows else budget_rows
    n_steps = -(-R // tile_r)                   # cdiv; ragged tail masked in-kernel

    # Day-boundary pair mask over local rows (same for every block).
    pair_mask = ((np.arange(tile_r) % D) != (D - 1)).astype(np.float32)
    pair_mask = jnp.asarray(pair_mask.reshape(tile_r, 1))

    kernel = _make_kernel(D, N, tile_r, R)

    flops = 3 * 2 * R * (9 * N) * N + 12 * R * N
    bytes_accessed = (R * 9 * N * itemsize + int(sel.size) * 4 + tile_r * 4
                      + n_steps * 2 * 8 * 128 * 4)

    day_out, ineq_out = pl.pallas_call(
        kernel,
        out_shape=(jax.ShapeDtypeStruct((n_steps, 8, 128), jnp.float32),
                   jax.ShapeDtypeStruct((n_steps, 8, 128), jnp.float32)),
        grid=(n_steps,),
        in_specs=[
            pl.BlockSpec((tile_r, 9 * N), lambda i: (i, 0)),
            pl.BlockSpec((3, 9 * N, N), lambda i: (0, 0, 0)),   # resident
            pl.BlockSpec((tile_r, 1), lambda i: (0, 0)),        # resident
        ],
        out_specs=(
            pl.BlockSpec((1, 8, 128), lambda i: (i, 0, 0)),
            pl.BlockSpec((1, 8, 128), lambda i: (i, 0, 0)),
        ),
        compiler_params=pltpu.CompilerParams(
            dimension_semantics=("parallel",),
            vmem_limit_bytes=32 * 1024 * 1024,
        ),
        cost_estimate=pl.CostEstimate(flops=flops, transcendentals=0,
                                      bytes_accessed=bytes_accessed),
    )(x, sel, pair_mask)

    day_loss = day_out[:, 0, 0].sum() / float(R * N)
    if D > 1:
        ineq_loss = ineq_out[:, 0, 0].sum() / float(B * (D - 1))
    else:
        # TODO(synk): PyTorch MSELoss over an empty tensor is NaN; we return 0.
        ineq_loss = jnp.float32(0.0)
    return LAMBDA_ALLDIFF * day_loss + LAMBDA_INEQ * ineq_loss


def reference_loss(predictions):
    """Pure-JAX transliteration of the PyTorch forward for verification."""
    B, slots, N = predictions.shape
    D = slots // 9
    p = predictions.reshape(B, D, 3, 3, N)
    flat = p.reshape(B * D, 9, N)
    day_sum = flat.sum(axis=1)
    penalty = jnp.maximum(day_sum - 1.0, 0.0)
    loss = jnp.mean(penalty ** 2) + 0.1 * jnp.mean(day_sum * (1.0 - day_sum))
    last_shift = p[:, :-1, -1, :, :].sum(axis=-2)
    first_shift = p[:, 1:, 0, :, :].sum(axis=-2)
    overlap = (last_shift * first_shift).sum(axis=-1)
    ineq = jnp.mean(overlap ** 2)
    return LAMBDA_ALLDIFF * loss + LAMBDA_INEQ * ineq


if __name__ == "__main__":
    # Small deterministic example: batch=2, num_days=4, num_nurses=8.
    key = jax.random.PRNGKey(0)
    B, D, N = 2, 4, 8
    predictions = jax.random.uniform(key, (B, D * 3 * 3, N), dtype=jnp.float32)

    loss = custom_nr_loss_mse(predictions)
    jax.block_until_ready(loss)
    ref = reference_loss(predictions)
    err = abs(float(loss) - float(ref))
    assert err <= 2e-3 * max(1.0, abs(float(ref))), (float(loss), float(ref))

    # Exercise the multi-step grid + ragged-tail masking path with a forced
    # small row tile (B=5 batches, 8 rows/block -> 3 blocks, last one ragged).
    key2 = jax.random.PRNGKey(1)
    B2, D2, N2 = 5, 4, 8
    pred2 = jax.random.uniform(key2, (B2, D2 * 3 * 3, N2), dtype=jnp.float32)
    loss2 = custom_nr_loss_mse(pred2, _force_rows=8)
    jax.block_until_ready(loss2)
    ref2 = reference_loss(pred2)
    err2 = abs(float(loss2) - float(ref2))
    assert err2 <= 2e-3 * max(1.0, abs(float(ref2))), (float(loss2), float(ref2))

    print("KERNEL_OK")
</pallas_src>

<mosaic_0001>
module attributes {stable_mosaic.version = 11 : i64} {
  func.func @kernel(%arg0: i32, %arg1: memref<8x72xf32, #tpu.memory_space<vmem>>, %arg2: memref<3x72x8xf32, #tpu.memory_space<vmem>>, %arg3: memref<8x1xf32, #tpu.memory_space<vmem>>, %arg4: memref<1x8x128xf32, #tpu.memory_space<vmem>>, %arg5: memref<1x8x128xf32, #tpu.memory_space<vmem>>) attributes {dimension_semantics = [#tpu.dimension_semantics<parallel>], iteration_bounds = array<i64: 1>, scalar_prefetch = 0 : i64, scratch_operands = 0 : i64, tpu.core_type = #tpu.core_type<tc>, window_params = [{transform_indices = @transform_0, window_bounds = array<i64: 8, 72>}, {pipeline_mode = #tpu.pipeline_mode<synchronous>, transform_indices = @transform_1, window_bounds = array<i64: 3, 72, 8>}, {pipeline_mode = #tpu.pipeline_mode<synchronous>, transform_indices = @transform_2, window_bounds = array<i64: 8, 1>}, {transform_indices = @transform_3, window_bounds = array<i64: 1, 8, 128>}, {transform_indices = @transform_4, window_bounds = array<i64: 1, 8, 128>}]} {
    %c0 = arith.constant 0 : index
    %c0_0 = arith.constant 0 : index
    %0 = vector.load %arg1[%c0, %c0_0] : memref<8x72xf32, #tpu.memory_space<vmem>>, vector<8x72xf32>
    %c0_1 = arith.constant 0 : index
    %c0_2 = arith.constant 0 : index
    %c0_3 = arith.constant 0 : index
    %1 = vector.load %arg2[%c0_1, %c0_2, %c0_3] : memref<3x72x8xf32, #tpu.memory_space<vmem>>, vector<1x72x8xf32>
    %2 = vector.shape_cast %1 : vector<1x72x8xf32> to vector<72x8xf32>
    %cst = arith.constant dense<0.000000e+00> : vector<8x8xf32>
    %3 = tpu.matmul %0, %2, %cst {dimension_numbers = #tpu.dot_dimension_numbers<[1], [0], [0], [1], [0, 0, 1, 1], [], []>} : vector<8x72xf32>, vector<72x8xf32>, vector<8x8xf32> -> vector<8x8xf32>
    %c1 = arith.constant 1 : index
    %c0_4 = arith.constant 0 : index
    %c0_5 = arith.constant 0 : index
    %4 = vector.load %arg2[%c1, %c0_4, %c0_5] : memref<3x72x8xf32, #tpu.memory_space<vmem>>, vector<1x72x8xf32>
    %5 = vector.shape_cast %4 : vector<1x72x8xf32> to vector<72x8xf32>
    %cst_6 = arith.constant dense<0.000000e+00> : vector<8x8xf32>
    %6 = tpu.matmul %0, %5, %cst_6 {dimension_numbers = #tpu.dot_dimension_numbers<[1], [0], [0], [1], [0, 0, 1, 1], [], []>} : vector<8x72xf32>, vector<72x8xf32>, vector<8x8xf32> -> vector<8x8xf32>
    %c2 = arith.constant 2 : index
    %c0_7 = arith.constant 0 : index
    %c0_8 = arith.constant 0 : index
    %7 = vector.load %arg2[%c2, %c0_7, %c0_8] : memref<3x72x8xf32, #tpu.memory_space<vmem>>, vector<1x72x8xf32>
    %8 = vector.shape_cast %7 : vector<1x72x8xf32> to vector<72x8xf32>
    %cst_9 = arith.constant dense<0.000000e+00> : vector<8x8xf32>
    %9 = tpu.matmul %0, %8, %cst_9 {dimension_numbers = #tpu.dot_dimension_numbers<[1], [0], [0], [1], [0, 0, 1, 1], [], []>} : vector<8x72xf32>, vector<72x8xf32>, vector<8x8xf32> -> vector<8x8xf32>
    %10 = tpu.iota {dimensions = array<i32: 0>} : vector<8x1xi32>
    %c8_i32 = arith.constant 8 : i32
    %11 = arith.muli %arg0, %c8_i32 : i32
    %c8_i32_10 = arith.constant 8 : i32
    %12 = arith.subi %c8_i32_10, %11 : i32
    %13 = vector.broadcast %12 : i32 to vector<8x1xi32>
    %14 = arith.cmpi slt, %10, %13 : vector<8x1xi32>
    %15 = arith.addf %3, %6 : vector<8x8xf32>
    %16 = arith.addf %15, %9 : vector<8x8xf32>
    %cst_11 = arith.constant 0.000000e+00 : f32
    %17 = vector.shape_cast %14 : vector<8x1xi1> to vector<8x1xi1>
    %18 = vector.broadcast %17 : vector<8x1xi1> to vector<8x8xi1>
    %19 = vector.broadcast %cst_11 : f32 to vector<8x8xf32>
    %20 = arith.select %18, %16, %19 : vector<8x8xi1>, vector<8x8xf32>
    %cst_12 = arith.constant 1.000000e+00 : f32
    %21 = vector.broadcast %cst_12 : f32 to vector<8x8xf32>
    %22 = arith.subf %20, %21 : vector<8x8xf32>
    %cst_13 = arith.constant 0.000000e+00 : f32
    %23 = vector.broadcast %cst_13 : f32 to vector<8x8xf32>
    %24 = arith.maximumf %22, %23 : vector<8x8xf32>
    %25 = arith.mulf %24, %24 : vector<8x8xf32>
    %26 = arith.mulf %20, %20 : vector<8x8xf32>
    %27 = arith.subf %20, %26 : vector<8x8xf32>
    %cst_14 = arith.constant 1.000000e-01 : f32
    %28 = vector.broadcast %cst_14 : f32 to vector<8x8xf32>
    %29 = arith.mulf %28, %27 : vector<8x8xf32>
    %30 = arith.addf %25, %29 : vector<8x8xf32>
    %31 = vector.shape_cast %30 : vector<8x8xf32> to vector<1x8x8xf32>
    %cst_15 = arith.constant dense<0.000000e+00> : vector<1xf32>
    %32 = vector.multi_reduction <add>, %31, %cst_15 [1, 2] : vector<1x8x8xf32> to vector<1xf32>
    %33 = vector.shape_cast %32 : vector<1xf32> to vector<1x1x1xf32>
    %34 = vector.extract %33[0, 0, 0] : f32 from vector<1x1x1xf32>
    %35 = vector.extract_strided_slice %9 {offsets = [0, 0], sizes = [7, 8], strides = [1, 1]} : vector<8x8xf32> to vector<7x8xf32>
    %36 = vector.extract_strided_slice %3 {offsets = [1, 0], sizes = [7, 8], strides = [1, 1]} : vector<8x8xf32> to vector<7x8xf32>
    %37 = arith.mulf %35, %36 : vector<7x8xf32>
    %cst_16 = arith.constant dense<0.000000e+00> : vector<7xf32>
    %38 = vector.multi_reduction <add>, %37, %cst_16 [1] : vector<7x8xf32> to vector<7xf32>
    %39 = vector.shape_cast %38 : vector<7xf32> to vector<7x1xf32>
    %c0_17 = arith.constant 0 : index
    %c0_18 = arith.constant 0 : index
    %40 = vector.load %arg3[%c0_17, %c0_18] : memref<8x1xf32, #tpu.memory_space<vmem>>, vector<7x1xf32>
    %41 = arith.mulf %39, %40 : vector<7x1xf32>
    %42 = vector.extract_strided_slice %10 {offsets = [0, 0], sizes = [7, 1], strides = [1, 1]} : vector<8x1xi32> to vector<7x1xi32>
    %c1_i32 = arith.constant 1 : i32
    %43 = vector.broadcast %c1_i32 : i32 to vector<7x1xi32>
    %44 = arith.addi %42, %43 : vector<7x1xi32>
    %45 = vector.broadcast %12 : i32 to vector<7x1xi32>
    %46 = arith.cmpi slt, %44, %45 : vector<7x1xi32>
    %cst_19 = arith.constant 0.000000e+00 : f32
    %47 = vector.broadcast %cst_19 : f32 to vector<7x1xf32>
    %48 = arith.select %46, %41, %47 : vector<7x1xi1>, vector<7x1xf32>
    %49 = arith.mulf %48, %48 : vector<7x1xf32>
    %50 = vector.shape_cast %49 : vector<7x1xf32> to vector<1x7x1xf32>
    %cst_20 = arith.constant dense<0.000000e+00> : vector<1xf32>
    %51 = vector.multi_reduction <add>, %50, %cst_20 [1, 2] : vector<1x7x1xf32> to vector<1xf32>
    %52 = vector.shape_cast %51 : vector<1xf32> to vector<1x1x1xf32>
    %53 = vector.extract %52[0, 0, 0] : f32 from vector<1x1x1xf32>
    %54 = vector.broadcast %34 : f32 to vector<1x8x128xf32>
    %c0_21 = arith.constant 0 : index
    %c0_22 = arith.constant 0 : index
    %c0_23 = arith.constant 0 : index
    %55 = vector.load %arg4[%c0_21, %c0_22, %c0_23] : memref<1x8x128xf32, #tpu.memory_space<vmem>>, vector<1x8x128xf32>
    tpu.vector_store %arg4[%c0_21, %c0_22, %c0_23], %54 {strides = array<i32>} : memref<1x8x128xf32, #tpu.memory_space<vmem>>, vector<1x8x128xf32>,
    %56 = vector.broadcast %53 : f32 to vector<1x8x128xf32>
    %c0_24 = arith.constant 0 : index
    %c0_25 = arith.constant 0 : index
    %c0_26 = arith.constant 0 : index
    %57 = vector.load %arg5[%c0_24, %c0_25, %c0_26] : memref<1x8x128xf32, #tpu.memory_space<vmem>>, vector<1x8x128xf32>
    tpu.vector_store %arg5[%c0_24, %c0_25, %c0_26], %56 {strides = array<i32>} : memref<1x8x128xf32, #tpu.memory_space<vmem>>, vector<1x8x128xf32>,
    return
  }
  func.func @transform_0(%arg0: i32) -> (i32, i32) {
    %c0_i32 = arith.constant 0 : i32
    %c0_i32_0 = arith.constant 0 : i32
    return %arg0, %c0_i32 : i32, i32
  }
  func.func @transform_1(%arg0: i32) -> (i32, i32, i32) {
    %c0_i32 = arith.constant 0 : i32
    %c0_i32_0 = arith.constant 0 : i32
    %c0_i32_1 = arith.constant 0 : i32
    %c0_i32_2 = arith.constant 0 : i32
    return %c0_i32, %c0_i32_0, %c0_i32_1 : i32, i32, i32
  }
  func.func @transform_2(%arg0: i32) -> (i32, i32) {
    %c0_i32 = arith.constant 0 : i32
    %c0_i32_0 = arith.constant 0 : i32
    %c0_i32_1 = arith.constant 0 : i32
    return %c0_i32, %c0_i32_0 : i32, i32
  }
  func.func @transform_3(%arg0: i32) -> (i32, i32, i32) {
    %c0_i32 = arith.constant 0 : i32
    %c0_i32_0 = arith.constant 0 : i32
    %c0_i32_1 = arith.constant 0 : i32
    return %arg0, %c0_i32, %c0_i32_0 : i32, i32, i32
  }
  func.func @transform_4(%arg0: i32) -> (i32, i32, i32) {
    %c0_i32 = arith.constant 0 : i32
    %c0_i32_0 = arith.constant 0 : i32
    %c0_i32_1 = arith.constant 0 : i32
    return %arg0, %c0_i32, %c0_i32_0 : i32, i32, i32
  }
}

</mosaic_0001>

<bundles_post_ra>
// kernel: tpu_custom_call.1
= control target key start
LH: loop header
LB: loop body
LE: loop exit
PB: predicated region body
PF: predicated region fallthrough
CT: control target
= control target key end

     0   :  { %10 = vsyncpa [#allocation3], 0  ;;  %s402_s0 = inlined_call_operand.vmem [shape: f32[8,72], index: 0, kind: input, shape index: {}]   ;;  %s403_s1 = inlined_call_operand.vmem [shape: f32[3,72,8], index: 1, kind: input, shape index: {}]   ;;  %s404_s2 = inlined_call_operand.vmem [shape: f32[8,1], index: 2, kind: input, shape index: {}]   ;;  %s405_s3 = inlined_call_operand.hbm [shape: f32[1,8,128], index: 3, kind: output, shape index: {0}]   ;;  %s406_s4 = inlined_call_operand.hbm [shape: f32[1,8,128], index: 4, kind: output, shape index: {1}]  }
   0x1   :  { %v221_v0 = vld [vmem:[%s403_s1 + $0xd0] sm:$0xff]  ;;  %v220_v1 = vld [vmem:[%s403_s1 + $0xc8] sm:$0xff]  ;;  %v27_v2 = vld [vmem:[%s403_s1 + $0x40] sm:$0xff] }
   0x2   :  { %99 = vmatpush.msra.mxu2 %v221_v0  ;;  %39 = vmatpush.msra.mxu0 %v27_v2  ;;  %v211_v3 = vld [vmem:[%s403_s1 + $0x88] sm:$0xff]  ;;  %v26_v4 = vld [vmem:[%s403_s1 + $0x38] sm:$0xff]  ;;  %v219_v5 = vld [vmem:[%s403_s1 + $0xc0] sm:$0xff] }
   0x3   :  { %69 = vmatpush.msra.mxu1 %v211_v3  ;;  %v210_v6 = vld [vmem:[%s403_s1 + $0x80] sm:$0xff]  ;;  %v25_v7 = vld [vmem:[%s403_s1 + $0x30] sm:$0xff]  ;;  %v209_v8 = vld [vmem:[%s403_s1 + $0x78] sm:$0xff] }
   0x4   :  { %100 = vmatpush.msra.mxu2 %v220_v1  ;;  %40 = vmatpush.msra.mxu0 %v26_v4  ;;  %v218_v9 = vld [vmem:[%s403_s1 + $0xb8] sm:$0xff]  ;;  %v24_v10 = vld [vmem:[%s403_s1 + $0x28] sm:$0xff]  ;;  %v208_v11 = vld [vmem:[%s403_s1 + $0x70] sm:$0xff] }
   0x5   :  { %70 = vmatpush.msra.mxu1 %v210_v6  ;;  %v217_v12 = vld [vmem:[%s403_s1 + $0xb0] sm:$0xff]  ;;  %v23_v13 = vld [vmem:[%s403_s1 + $0x20] sm:$0xff]  ;;  %v207_v14 = vld [vmem:[%s403_s1 + $0x68] sm:$0xff] }
   0x6   :  { %101 = vmatpush.msra.mxu2 %v219_v5  ;;  %41 = vmatpush.msra.mxu0 %v25_v7  ;;  %v216_v15 = vld [vmem:[%s403_s1 + $0xa8] sm:$0xff]  ;;  %v22_v16 = vld [vmem:[%s403_s1 + $0x18] sm:$0xff]  ;;  %v206_v17 = vld [vmem:[%s403_s1 + $0x60] sm:$0xff] }
   0x7   :  { %71 = vmatpush.msra.mxu1 %v209_v8 }
   0x8   :  { %102 = vmatpush.msra.mxu2 %v218_v9  ;;  %42 = vmatpush.msra.mxu0 %v24_v10 }
   0x9   :  { %72 = vmatpush.msra.mxu1 %v208_v11 }
   0xa   :  { %103 = vmatpush.msra.mxu2 %v217_v12  ;;  %43 = vmatpush.msra.mxu0 %v23_v13 }
   0xb   :  { %11 = vsyncpa [#allocation5], 0  ;;  %73 = vmatpush.msra.mxu1 %v207_v14  ;;  %v215_v18 = vld [vmem:[%s403_s1 + $0xa0] sm:$0xff]  ;;  %v21_v19 = vld [vmem:[%s403_s1 + $0x10] sm:$0xff]  ;;  %vm28_vm0 = vcmask 588800   ;;  %vm145_vm1 = vcmask 63488   ;;  %v112_v44 = vlaneseq }
   0xc   :  { %104 = vmatpush.msra.mxu2 %v216_v15  ;;  %44 = vmatpush.msra.mxu0 %v22_v16  ;;  %v205_v20 = vld [vmem:[%s403_s1 + $0x58] sm:$0xff]  ;;  %v20_v22 = vld [vmem:[%s403_s1 + $0x8] sm:$0xff]  ;;  %v204_v23 = vld [vmem:[%s403_s1 + $0x50] sm:$0xff]  ;;  %vm130_vm2 = vcmask 64512   ;;  %vm155_vm4 = vcmask 6144   ;;  %s282_s19 = smov [#allocation2]  }
   0xd   :  { %74 = vmatpush.msra.mxu1 %v206_v17  ;;  %v214_v21 = vld [vmem:[%s403_s1 + $0x98] sm:$0xff]  ;;  %v213_v24 = vld [vmem:[%s403_s1 + $0x90] sm:$0xff]  ;;  %v19_v25 = vld [vmem:[%s403_s1] sm:$0xff]  ;;  %v113_v45 = vshrl.u32 %v112_v44, 7  ;;  %s175_s20 = sshll.u32 %s282_s19, 4  ;;  %s177_s22 = sshll.u32 %s405_s3, 4  ;;  %s176_s20 = int_to_ptr.vmem [resolvable:$true] %s175_s20  ;;  %s178_s22 = int_to_ptr.hbm [resolvable:$true] %s177_s22 }
   0xe   :  { %105 = vmatpush.msra.mxu2 %v215_v18  ;;  %45 = vmatpush.msra.mxu0 %v21_v19  ;;  %v18_v26 = vld [vmem:[%s402_s0] sm:$0xff]  ;;  %v203_v27 = vld [vmem:[%s403_s1 + $0x48] sm:$0xff]  ;;  %s283_s24 = smov [#allocation4]   ;;  %s188_s3 = sshll.u32 %s406_s4, 4  ;;  %s189_s3 = int_to_ptr.hbm [resolvable:$true] %s188_s3 }
   0xf   :  { %75 = vmatpush.msra.mxu1 %v205_v20  ;;  %v151_v46 = vadd.s32 1, %v113_v45  ;;  %v149_v47 = vld [vmem:[%s404_s2] sm:$0x7f]  ;;  %s186_s25 = sshll.u32 %s283_s24, 4  ;;  %s187_s25 = int_to_ptr.vmem [resolvable:$true] %s186_s25 }
  0x10   :  { %106 = vmatpush.msra.mxu2 %v214_v21  ;;  %46 = vmatpush.msra.mxu0 %v20_v22 }
  0x11   :  { %76 = vmatpush.msra.mxu1 %v204_v23  ;;  %vm152_vm3 = vcmp.lt.s32.totalorder %v151_v46, 8 }
  0x12   :  { %107 = vmatpush.msra.mxu2 %v213_v24  ;;  %47 = vmatpush.msra.mxu0 %v19_v25 }
  0x13   :  { %222 = vmatmul.msk.f32.vlgmr.msra.gmra.mxu2 %vm28_vm0, %v18_v26  ;;  %77 = vmatpush.msra.mxu1 %v203_v27 }
  0x14   :  { %202 = vmatmul.msk.f32.vlgmr.msra.gmra.mxu0 %vm28_vm0, %v18_v26  ;;  %212 = vmatmul.msk.f32.vlgmr.msra.gmra.mxu1 %vm28_vm0, %v18_v26 }
  0x91   :  { %v49_v28 = vpop.f32.mrf.mxu0  ;;  %v79_v29 = vpop.f32.mrf.mxu1 }
  0x92   :  { %v142_v30 = vrot.slane %v49_v28, 1  ;;  %v118_v31 = vadd.f32 %v79_v29, %v49_v28 }
  0x96   :  { %v109_v32 = vpop.f32.mrf.mxu2 }
  0x97   :  { %v119_v33 = vadd.f32 %v118_v31, %v109_v32  ;;  %v144_v34 = vmul.f32 %v142_v30, %v109_v32 }
  0x99   :  { %v223_v35 = vadd.f32 -1.0, %v119_v33  ;;  %v126_v36 = vmul.f32 %v119_v33, %v119_v33  ;;  %v146_v37 = vsel %vm145_vm1, %v144_v34, 0.0 }
  0x9a   :  { %147 = vadd.xlane.f32.xlu0 %v146_v37 }
  0x9b   :  { %v124_v38 = vmax.f32 %v223_v35, 0.0  ;;  %v127_v39 = vsub.f32 %v119_v33, %v126_v36 }
  0x9d   :  { %v125_v40 = vmul.f32 %v124_v38, %v124_v38  ;;  %v128_v41 = vmul.f32 0.1, %v127_v39 }
  0x9f   :  { %v129_v42 = vadd.f32 %v128_v41, %v125_v40 }
  0xa1   :  { %v131_v43 = vsel %vm130_vm2, %v129_v42, 0.0 }
  0xa2   :  { %132 = vadd.xlane.f32.xlu0 %v131_v43 }
 0x10d   :  { %v148_v48 = vpop.xlane.xlu0 %147 }
 0x10e   :  { %v150_v49 = vmul.f32 %v149_v47, %v148_v48 }
 0x110   :  { %v153_v50 = vsel %vm152_vm3, %v150_v49, 0.0 }
 0x111   :  { %v154_v51 = vmul.f32 %v153_v50, %v153_v50 }
 0x113   :  { %v156_v52 = vsel %vm155_vm4, %v154_v51, 0.0 }
 0x114   :  { %157 = vadd.xlane.f32.xlu1 %v156_v52 }
 0x115   :  { %v133_v53 = vpop.xlane.xlu0 %132 }
 0x116   :  { %v134_v54 = vrot.slane %v133_v53, 4 }
 0x118   :  { %v135_v55 = vadd.f32 %v134_v54, %v133_v53 }
 0x11a   :  { %v136_v56 = vrot.slane %v135_v55, 2 }
 0x11c   :  { %v137_v57 = vadd.f32 %v136_v56, %v135_v55 }
 0x11e   :  { %v138_v58 = vrot.slane %v137_v57, 1 }
 0x120   :  { %v139_v59 = vadd.f32 %v138_v58, %v137_v57 }
 0x122   :  { %224 = vpush %v139_v59 }
 0x153   :  { %s225_s23 = spop %224 }
 0x154   :  { %v166_v60 = vstv %s225_s23 }
 0x155   :  { %167 = vst [vmem:[#allocation2] sm:$0xff] %v166_v60 }
 0x156   :  { %180 = dma.vmem_to_hbm [thread:$0]  %s176_s20, 128, %s178_s22, [#allocation3]  }
 0x187   :  { %v158_v61 = vpop.xlane.xlu1 %157 }
 0x188   :  { %v159_v62 = vrot.slane %v158_v61, 4 }
 0x18a   :  { %v160_v63 = vadd.f32 %v159_v62, %v158_v61 }
 0x18c   :  { %v161_v0 = vrot.slane %v160_v63, 2 }
 0x18e   :  { %v162_v1 = vadd.f32 %v161_v0, %v160_v63 }
 0x190   :  { %v163_v2 = vrot.slane %v162_v1, 1 }
 0x192   :  { %v164_v3 = vadd.f32 %v163_v2, %v162_v1 }
 0x194   :  { %226 = vpush %v164_v3 }
 0x1c5   :  { %s227_s28 = spop %226 }
 0x1c6   :  { %v168_v4 = vstv %s227_s28 }
 0x1c7   :  { %169 = vst [vmem:[#allocation4] sm:$0xff] %v168_v4 }
 0x1c8   :  { %191 = dma.vmem_to_hbm [thread:$0]  %s187_s25, 128, %s189_s3, [#allocation5]  }
 0x1c9   :  { %278 = dma.done.wait [#allocation3], 128  }
 0x1ca   :  { %279 = vsyncadd [#allocation3], 4294967168 }
 0x1cb   :  { %280 = dma.done.wait [#allocation5], 128  }
 0x1cc   :  { %281 = vsyncadd [#allocation5], 4294967168 }
 0x1cd   :  { %200 = vsyncpa [#allocation3], 1 }
 0x1ce   :  { %201 = vsyncpa [#allocation5], 1 }

</bundles_post_ra>
